<compile_context>
chip_gen: v7x
topology: tpu7x:2x2x1
jax: 0.10.0
libtpu: 0.0.40
codegen_flags: <defaults>
</compile_context>

<pallas_src>
import jax
import jax.numpy as jnp
from jax.experimental import pallas as pl
from jax.experimental.pallas import tpu as pltpu

_EPS = 1.0e-4


def _bifpn_concat2_kernel(s_ref, x0_ref, x1_ref, o_ref):
    # s_ref: (2,) float32 pre-normalized weights in SMEM.
    c0 = x0_ref.shape[1]
    # Lane-dense full-width stores; channel concat via static sublane offsets.
    o_ref[:, :c0, :] = (x0_ref[...] * s_ref[0]).astype(o_ref.dtype)
    o_ref[:, c0:, :] = (x1_ref[...] * s_ref[1]).astype(o_ref.dtype)


def _tpu_vmem_caps():
    """(per-step double-buffered footprint budget, vmem_limit ceiling) in bytes."""
    try:
        cap = int(pltpu.get_tpu_info().vmem_capacity_bytes)
    except Exception:
        cap = 64 << 20  # assume the smallest (v7x-like) if the query is unavailable
    if cap <= (64 << 20):            # v7x: 64 MiB physical VMEM
        return 12 << 20, 40 << 20
    return 16 << 20, 96 << 20        # v5e / v6e: 128 MiB physical VMEM


def _pick_spatial_tile(n, hw, c_total, in_itemsize, out_itemsize, budget_bytes):
    """Largest lane-dense (multiple-of-128) spatial tile whose double-buffered
    per-step VMEM footprint (x0 + x1 inputs + output) stays under budget, then
    shrunk if needed so the grid has enough depth for v7x's two TensorCores."""
    per_lane = 2 * c_total * (in_itemsize + out_itemsize)   # double-buffered bytes/lane
    t = max(128, (budget_bytes // per_lane) // 128 * 128)
    if t >= hw:
        t = hw                                              # whole spatial extent
    # Megacore depth guard: want >= ~8 grid steps so each of 2 TCs gets >= 4.
    while t > 128 and n * pl.cdiv(hw, t) < 8:
        t = max(128, (t // 2) // 128 * 128)
    return t


def bifpn_concat2(w, x0, x1):
    """w: (2,) weights; x0: (N, C0, H, W); x1: (N, C1, H, W) (same N, H, W, dtype)."""
    assert x0.dtype == x1.dtype, "inputs must share a dtype"
    n, c0, h, wd = x0.shape
    n1, c1, h1, w1 = x1.shape
    assert (n, h, wd) == (n1, h1, w1), "batch/spatial dims must match"

    hw = h * wd
    c_total = c0 + c1

    # Hoisted weight normalization (the kernel just reads two scalars).
    w32 = w.astype(jnp.float32)
    s = w32 / (jnp.sum(w32) + _EPS)

    # Free contiguous reshapes: lane dim becomes H*W, channels sit on the sublane axis.
    x0f = x0.reshape(n, c0, hw)
    x1f = x1.reshape(n, c1, hw)

    # Output dtype matches the reference promotion: f32 weight * input dtype.
    out_dtype = jnp.promote_types(jnp.float32, x0.dtype)

    in_size = jnp.dtype(x0.dtype).itemsize
    out_size = jnp.dtype(out_dtype).itemsize

    budget, limit_cap = _tpu_vmem_caps()
    t = _pick_spatial_tile(n, hw, c_total, in_size, out_size, budget)

    # Actual double-buffered per-step footprint; give the compiler matching headroom.
    footprint = 2 * c_total * (in_size + out_size) * t
    vmem_limit = int(min(limit_cap, max(32 << 20, footprint + (4 << 20))))
    # TODO(synk): add a channel-blocking grid axis if `footprint` at t=128 ever
    # exceeds `limit_cap` (extremely wide concats); not needed for BiFPN shapes.

    grid = (n, pl.cdiv(hw, t))

    out = pl.pallas_call(
        _bifpn_concat2_kernel,
        out_shape=jax.ShapeDtypeStruct((n, c_total, hw), out_dtype),
        grid=grid,
        in_specs=[
            pl.BlockSpec(memory_space=pltpu.MemorySpace.SMEM),     # (2,) normalized weights
            pl.BlockSpec((1, c0, t), lambda b, j: (b, 0, j)),       # x0 tile
            pl.BlockSpec((1, c1, t), lambda b, j: (b, 0, j)),       # x1 tile
        ],
        out_specs=pl.BlockSpec((1, c_total, t), lambda b, j: (b, 0, j)),
        compiler_params=pltpu.CompilerParams(
            dimension_semantics=("parallel", "parallel"),
            vmem_limit_bytes=vmem_limit),
    )(s, x0f, x1f)

    return out.reshape(n, c_total, h, wd)


def reference(w, x0, x1):
    w32 = w.astype(jnp.float32)
    weight = w32 / (jnp.sum(w32) + _EPS)
    return jnp.concatenate([weight[0] * x0, weight[1] * x1], axis=1)


if __name__ == "__main__":
    key = jax.random.PRNGKey(0)
    k0, k1 = jax.random.split(key)

    # Module __init__: self.w = nn.Parameter(torch.ones(2)) -> deterministic init.
    w = jnp.ones((2,), dtype=jnp.float32)

    # Small NCHW inputs consistent with the forward pass.
    x0 = jax.random.normal(k0, (2, 4, 16, 16), dtype=jnp.float32)
    x1 = jax.random.normal(k1, (2, 4, 16, 16), dtype=jnp.float32)

    out = jax.block_until_ready(bifpn_concat2(w, x0, x1))

    ref = reference(w, x0, x1)
    assert out.shape == (2, 8, 16, 16), out.shape
    assert out.dtype == ref.dtype, (out.dtype, ref.dtype)
    assert jnp.allclose(out, ref, atol=1e-6, rtol=1e-6), "mismatch vs reference"

    print("KERNEL_OK")
</pallas_src>

<mosaic_0001>
module attributes {stable_mosaic.version = 11 : i64} {
  func.func @_bifpn_concat2_kernel(%arg0: i32, %arg1: i32, %arg2: memref<2xf32, #tpu.memory_space<smem>>, %arg3: memref<1x4x128xf32, #tpu.memory_space<vmem>>, %arg4: memref<1x4x128xf32, #tpu.memory_space<vmem>>, %arg5: memref<1x8x128xf32, #tpu.memory_space<vmem>>) attributes {dimension_semantics = [#tpu.dimension_semantics<parallel>, #tpu.dimension_semantics<parallel>], iteration_bounds = array<i64: 2, 2>, scalar_prefetch = 0 : i64, scratch_operands = 0 : i64, tpu.core_type = #tpu.core_type<tc>, window_params = [{transform_indices = @transform_0, window_bounds = array<i64: 2>}, {transform_indices = @transform_1, window_bounds = array<i64: 1, 4, 128>}, {transform_indices = @transform_2, window_bounds = array<i64: 1, 4, 128>}, {transform_indices = @transform_3, window_bounds = array<i64: 1, 8, 128>}]} {
    %c0 = arith.constant 0 : index
    %c0_0 = arith.constant 0 : index
    %c0_1 = arith.constant 0 : index
    %0 = vector.load %arg3[%c0, %c0_0, %c0_1] : memref<1x4x128xf32, #tpu.memory_space<vmem>>, vector<1x4x128xf32>
    %c0_2 = arith.constant 0 : index
    %1 = memref.load %arg2[%c0_2] : memref<2xf32, #tpu.memory_space<smem>>
    %2 = vector.broadcast %1 : f32 to vector<1x4x128xf32>
    %3 = arith.mulf %0, %2 : vector<1x4x128xf32>
    %c0_3 = arith.constant 0 : index
    %c0_4 = arith.constant 0 : index
    %c0_5 = arith.constant 0 : index
    %4 = vector.load %arg5[%c0_3, %c0_4, %c0_5] : memref<1x8x128xf32, #tpu.memory_space<vmem>>, vector<1x4x128xf32>
    tpu.vector_store %arg5[%c0_3, %c0_4, %c0_5], %3 {strides = array<i32>} : memref<1x8x128xf32, #tpu.memory_space<vmem>>, vector<1x4x128xf32>,
    %c0_6 = arith.constant 0 : index
    %c0_7 = arith.constant 0 : index
    %c0_8 = arith.constant 0 : index
    %5 = vector.load %arg4[%c0_6, %c0_7, %c0_8] : memref<1x4x128xf32, #tpu.memory_space<vmem>>, vector<1x4x128xf32>
    %c1 = arith.constant 1 : index
    %6 = memref.load %arg2[%c1] : memref<2xf32, #tpu.memory_space<smem>>
    %7 = vector.broadcast %6 : f32 to vector<1x4x128xf32>
    %8 = arith.mulf %5, %7 : vector<1x4x128xf32>
    %c0_9 = arith.constant 0 : index
    %c4 = arith.constant 4 : index
    %c0_10 = arith.constant 0 : index
    %9 = vector.load %arg5[%c0_9, %c4, %c0_10] : memref<1x8x128xf32, #tpu.memory_space<vmem>>, vector<1x4x128xf32>
    tpu.vector_store %arg5[%c0_9, %c4, %c0_10], %8 {strides = array<i32>} : memref<1x8x128xf32, #tpu.memory_space<vmem>>, vector<1x4x128xf32>,
    return
  }
  func.func @transform_0(%arg0: i32, %arg1: i32) -> i32 {
    %c0_i32 = arith.constant 0 : i32
    %c0_i32_0 = arith.constant 0 : i32
    return %c0_i32 : i32
  }
  func.func @transform_1(%arg0: i32, %arg1: i32) -> (i32, i32, i32) {
    %c0_i32 = arith.constant 0 : i32
    %c0_i32_0 = arith.constant 0 : i32
    return %arg0, %c0_i32, %arg1 : i32, i32, i32
  }
  func.func @transform_2(%arg0: i32, %arg1: i32) -> (i32, i32, i32) {
    %c0_i32 = arith.constant 0 : i32
    %c0_i32_0 = arith.constant 0 : i32
    return %arg0, %c0_i32, %arg1 : i32, i32, i32
  }
  func.func @transform_3(%arg0: i32, %arg1: i32) -> (i32, i32, i32) {
    %c0_i32 = arith.constant 0 : i32
    %c0_i32_0 = arith.constant 0 : i32
    return %arg0, %c0_i32, %arg1 : i32, i32, i32
  }
}

</mosaic_0001>

<bundles_post_ra>
// kernel: tpu_custom_call.1
= control target key start
LH: loop header
LB: loop body
LE: loop exit
PB: predicated region body
PF: predicated region fallthrough
CT: control target
= control target key end

     0   :  { %s1015_s0 = inlined_call_operand.hbm [shape: f32[2], index: 0, kind: input, shape index: {}]   ;;  %s1016_s1 = inlined_call_operand.hbm [shape: f32[2,4,256], index: 1, kind: input, shape index: {}]   ;;  %s1017_s2 = inlined_call_operand.hbm [shape: f32[2,4,256], index: 2, kind: input, shape index: {}]   ;;  %s1018_s3 = inlined_call_operand.hbm [shape: f32[2,8,256], index: 3, kind: output, shape index: {}]  }
   0x1   :  { %1029 = sst [smem:[#allocation17_spill]] %s1015_s0 }
   0x2   :  { %1030 = sst [smem:[#allocation18_spill]] %s1016_s1 }
   0x3   :  { %8 = vsyncpa [#allocation5], 0 }
   0x4   :  { %9 = vsyncpa [#allocation3], 0 }
   0x5   :  { %11 = vsyncpa [#allocation3 + $0x1], 0 }
   0x6   :  { %12 = vsyncpa [#allocation8], 0 }
   0x7   :  { %14 = vsyncpa [#allocation8 + $0x1], 0 }
   0x8   :  { %15 = vsyncpa [#allocation4], 0 }
   0x9   :  { %17 = vsyncpa [#allocation4 + $0x1], 0  ;;  %s726_s12 = smov 0   ;;  %s728_s13 = smov 0  }
   0xa   :  { %s730_s14 = smov 0   ;;  %s732_s15 = smov 0  }
   0xb   :  { %s734_s16 = smov 0   ;;  %s736_s17 = smov 0  }
   0xc   :  { %s738_s18 = smov 0   ;;  %s740_s19 = smov 0  }
   0xd LB: > { %1031 = sst [smem:[#allocation14_spill]] %s672_s12  ;;  %s405_s20 = sadd.s32 4294967295, %s700_s19   ;;  %s700_s19 = sphi %s740_s19, %s23_s19   ;;  %s696_s18 = sphi %s738_s18, %s1063_s18   ;;  %s692_s17 = sphi %s736_s17, %s1062_s17   ;;  %s688_s16 = sphi %s734_s16, %s1061_s16   ;;  %s684_s15 = sphi %s732_s15, %s1060_s15   ;;  %s680_s14 = sphi %s730_s14, %s1059_s14   ;;  %s676_s13 = sphi %s728_s13, %s1058_s13   ;;  %s672_s12 = sphi %s726_s12, %s1057_s12  }
   0xe   : > { %s406_s21 = sadd.s32 4294967294, %s700_s19   ;;  %p1019_p0 = scmp.ne.s32.totalorder %s680_s14, %s676_s13 }
   0xf   : > { %p78_p1 = scmp.ne.s32.totalorder %s676_s13, %s672_s12  ;;  %p772_p2 = scmp.eq.s32.totalorder %s405_s20, 0 }
  0x10   : > { %p132_p3 = scmp.eq.s32.totalorder %s405_s20, 3  ;;  %p138_p4 = scmp.eq.s32.totalorder %s406_s21, 3 }
  0x11   : > { %s1032_s22 = scalar_select %p772_p2, 1, 0 }
  0x12   : > { %p407_p5 = scmp.ge.s32.totalorder %s700_s19, 1  ;;  %p779_p6 = por %p772_p2, %p78_p1 }
  0x13   : > { %p786_p7 = por %p132_p3, %p1019_p0  ;;  %p790_p8 = por %p138_p4, %p78_p1 }
  0x14   : > { %s1033_s23 = scalar_select %p779_p6, 1, 0 }
  0x15   : > { %s1034_s24 = scalar_select %p786_p7, 1, 0 }
  0x16   : > { %s1035_s25 = scalar_select %p790_p8, 1, 0 }
  0x17   : > { %p145_p9 = scmp.lt.s32.totalorder %s700_s19, 5  ;;  %s35_s27 = sadd.s32 1, %s696_s18 }
  0x18   : > { %1036 = sst [smem:[#allocation15_spill]] %s1035_s25  ;;  %s32_s29 = sadd.s32 1, %s692_s17 }
  0x19   : > { %p795_p10 = pnand %p407_p5, %p145_p9  ;;  %p809_p13 = scmp.ge.s32.totalorder %s32_s29, 2 }
  0x1a   : > { %p73_p1 = scmp.eq.s32.totalorder %s700_s19, 0  ;;  %s1040_s0 = sld [smem:[#allocation17_spill]] }
  0x1b   : > { %s1037_s26 = scalar_select %p795_p10, 1, 0 }
  0x1c   : > { %p437_p11 = pneg %p795_p10 }
  0x1e   : > { %p804_p12 = pnand %p437_p11, %p772_p2 }
  0x20   : > { %s521_s7 = scalar_lea.hbm %s1040_s0, 16  ;;  %p523_p4 = pneg %p804_p12 }
  0x21   : > { %p522_p3 = scmp.ne.s32.totalorder %s1040_s0, %s521_s7  ;;  %p528_p11 = scmp.lt.u32.totalorder %s521_s7, %s1040_s0 }
  0x23   : > { %p524_p5 = pnand %p523_p4, %p522_p3 }
  0x25   : > { %p525_p9 = pneg %p524_p5 }
  0x27   : > { %p530_p0 = pnand %p528_p11, %p525_p9 }
  0x29   : > { %533 = shalt.err (!%p530_p0)
}
  0x2a   : > { %s702_s20 = smov [#allocation2]   ;;  %s1065_s29 = smov (%p809_p13, %s32_s29), 0 }
  0x2b   : > { %440 = dma.hbm_to_smem (!%p804_p12), %s1040_s0, 16, %s702_s20, [#allocation5]  }
  0x2c   : > { %1041 = sst [smem:[#allocation16_spill]] %s1065_s29  ;;  %s1067_s27 = smov (!%p809_p13, %s35_s27), %s696_s18 }
  0x2d   : > { %s61_s28 = ssub.s32 %s692_s17, %s1065_s29  ;;  %p1042_p0 = scmp.ne.s32.totalorder %s680_s14, %s676_s13 }
  0x2e   : > { %p37_p4 = scmp.ge.s32.totalorder %s1067_s27, 2  ;;  %p453_p5 = scmp.lt.s32.totalorder %s700_s19, 4 }
  0x2f   : > { %p845_p3 = por %p73_p1, %p1042_p0  ;;  %s851_s7 = sand.u32 1, %s680_s14  }
  0x30   : > { %s411_s30 = sshll.u32 %s696_s18, 1  ;;  %s1069_s27 = smov (%p37_p4, %s1067_s27), 0 }
  0x31   : > { %s1023_s8 = sshll.u32 %s851_s7, 2  ;;  %s60_s9 = ssub.s32 %s696_s18, %s1069_s27 }
  0x32   : > { %s62_s10 = sor.u32 %s61_s28, %s60_s9  ;;  %s176_s11 = sadd.s32 %s692_s17, %s411_s30 }
  0x33   : > { %p63_p12 = scmp.eq.s32.totalorder %s62_s10, 0  ;;  %s412_s20 = sshll.u32 %s176_s11, 6 }
  0x34   : > { %s1044_s1 = sld [smem:[#allocation18_spill]]  ;;  %s171_s0 = scalar_lea.vmem [#allocation6], %s1023_s8 }
  0x35   : > { %s180_s29 = sshll.u32 %s171_s0, 4  ;;  %s1045_s25 = sadd.s32 1, %s680_s14  ;;  %s872_s29 = int_to_ptr.vmem [resolvable:$true] %s180_s29 }
  0x36   : > { %s870_s12 = scalar_select %p63_p12, %s680_s14, %s1045_s25  }
  0x37   : > { %p878_p13 = pnand %p453_p5, %p845_p3  ;;  %s885_s10 = scalar_lea.hbm %s1017_s2, %s412_s20 }
  0x38   : > { %s168_s11 = scalar_lea.sflag [#allocation3], %s851_s7 }
  0x39   : > { %p536_p9 = pneg %p878_p13 }
  0x3a   : > { %s863_s4 = scalar_lea.hbm %s1044_s1, %s412_s20  ;;  %s539_s21 = scalar_lea.hbm %s1044_s1, 256 }
  0x3b   : > { %s534_s0 = scalar_lea.hbm %s863_s4, 64  ;;  %p540_p3 = scmp.lt.u32.totalorder %s863_s4, %s1044_s1 }
  0x3c   : > { %p535_p1 = scmp.ne.s32.totalorder %s863_s4, %s534_s0  ;;  %p541_p4 = scmp.lt.u32.totalorder %s539_s21, %s534_s0 }
  0x3d   : > { %p543_p12 = scmp.lt.u32.totalorder %s534_s0, %s863_s4 }
  0x3e   : > { %p537_p11 = pnand %p536_p9, %p535_p1  ;;  %p542_p5 = por %p541_p4, %p540_p3 }
  0x40   : > { %p538_p0 = pneg %p537_p11  ;;  %p544_p8 = por %p543_p12, %p542_p5 }
  0x42   : > { %p545_p7 = pnand %p544_p8, %p538_p0 }
  0x44   : > { %548 = shalt.err (!%p545_p7)
}
  0x45   : > { %s549_s20 = scalar_lea.vmem %s872_s29, 64  ;;  %s703_s30 = smov [#allocation6]  }
  0x46   : > { %p550_p1 = scmp.ne.s32.totalorder %s872_s29, %s549_s20  ;;  %s554_s9 = sshll.u32 %s703_s30, 4  ;;  %s555_s9 = int_to_ptr.vmem [resolvable:$false] %s554_s9 }
  0x47   : > { %s556_s8 = scalar_lea.vmem %s555_s9, 128  ;;  %p557_p2 = scmp.lt.s32.totalorder %s872_s29, %s555_s9 }
  0x48   : > { %p552_p11 = pnand %p550_p1, %p536_p9  ;;  %p558_p3 = scmp.lt.s32.totalorder %s556_s8, %s549_s20 }
  0x4a   : > { %p553_p6 = pneg %p552_p11  ;;  %p559_p4 = por %p558_p3, %p557_p2 }
  0x4c   : > { %p560_p5 = pnand %p559_p4, %p553_p6 }
  0x4e   : > { %563 = shalt.err (!%p560_p5)
}
  0x4f   : > { %444 = dma.hbm_to_vmem [thread:$0]  (!%p878_p13), %s863_s4, 64, %s872_s29, %s168_s11  }
  0x50   : > { %s1047_s0 = sshll.u32 %s851_s7, 2  ;;  %s188_s21 = scalar_lea.sflag [#allocation8], %s851_s7 }
  0x51   : > { %s191_s25 = scalar_lea.vmem [#allocation7], %s1047_s0  ;;  %s564_s5 = scalar_lea.hbm %s885_s10, 64 }
  0x52   : > { %s200_s6 = sshll.u32 %s191_s25, 4  ;;  %p565_p2 = scmp.ne.s32.totalorder %s885_s10, %s564_s5  ;;  %s201_s6 = int_to_ptr.vmem [resolvable:$true] %s200_s6 }
  0x53   : > { %s569_s9 = scalar_lea.hbm %s1017_s2, 256  ;;  %p570_p8 = scmp.lt.u32.totalorder %s885_s10, %s1017_s2 }
  0x54   : > { %p567_p6 = pnand %p565_p2, %p536_p9  ;;  %p571_p0 = scmp.lt.u32.totalorder %s569_s9, %s564_s5 }
  0x55   : > { %p573_p1 = scmp.lt.u32.totalorder %s564_s5, %s885_s10 }
  0x56   : > { %p568_p7 = pneg %p567_p6  ;;  %p572_p12 = por %p571_p0, %p570_p8 }
  0x58   : > { %p574_p11 = por %p573_p1, %p572_p12 }
  0x5a   : > { %p575_p3 = pnand %p574_p11, %p568_p7 }
  0x5c   : > { %578 = shalt.err (!%p575_p3)
}
  0x5d   : > { %s579_s29 = scalar_lea.vmem %s201_s6, 64  ;;  %s704_s4 = smov [#allocation7]  }
  0x5e   : > { %p580_p4 = scmp.ne.s32.totalorder %s201_s6, %s579_s29  ;;  %s584_s7 = sshll.u32 %s704_s4, 4  ;;  %s585_s7 = int_to_ptr.vmem [resolvable:$false] %s584_s7 }
  0x5f   : > { %s586_s11 = scalar_lea.vmem %s585_s7, 128  ;;  %p587_p6 = scmp.lt.s32.totalorder %s201_s6, %s585_s7 }
  0x60   : > { %p582_p5 = pnand %p580_p4, %p536_p9  ;;  %p588_p10 = scmp.lt.s32.totalorder %s586_s11, %s579_s29 }
  0x62   : > { %p583_p2 = pneg %p582_p5  ;;  %p589_p0 = por %p588_p10, %p587_p6 }
  0x64   : > { %p590_p8 = pnand %p589_p0, %p583_p2 }
  0x66   : > { %593 = shalt.err (!%p590_p8)
}
  0x67   : > { %447 = dma.hbm_to_vmem [thread:$0]  (!%p878_p13), %s885_s10, 64, %s201_s6, %s188_s21  }
  0x68   : > { %p1048_p7 = scmp.ne.s32.totalorder %s1037_s26, 0 }
  0x69   : > { %p1049_p12 = scmp.ne.s32.totalorder (!%p1048_p7), %s1032_s22, 0 }
  0x6a   : > { %209 = sbr.rel (%p1048_p7) target bundleno = 150 (0x96), region = 32 }
  0x71   : > { %655 = dma.done.wait (%p1049_p12), [#allocation5], 16  }
  0x72   : > { %657 = vsyncadd (%p1049_p12), [#allocation5], 4294967280  ;;  %s942_s1 = sand.u32 1, %s676_s13   ;;  %p1050_p10 = scmp.ne.s32.totalorder %s1033_s23, 0 }
  0x73   : > { %s418_s0 = sshll.u32 %s942_s1, 2  ;;  %s216_s25 = scalar_lea.sflag [#allocation3], %s942_s1 }
  0x74   : > { %s219_s28 = scalar_lea.vmem [#allocation6], %s418_s0 }
  0x75   : > { %659 = dma.done.wait (%p1050_p10), %s216_s25, 64  }
  0x76   : > { %661 = vsyncadd (%p1050_p10), %s216_s25, 4294967232  ;;  %s225_s26 = scalar_lea.sflag [#allocation8], %s942_s1  ;;  %s228_s10 = scalar_lea.vmem [#allocation7], %s418_s0 }
  0x77   : > { %663 = dma.done.wait (%p1050_p10), %s225_s26, 64  }
  0x78   : > { %665 = vsyncadd (%p1050_p10), %s225_s26, 4294967232 }
  0x79   : > { %233 = sfence }
  0x7a   : > { %s420_s22 = sshll.u32 %s942_s1, 3  ;;  %s258_s6 = sld [smem:[#allocation2]]  ;;  %v257_v0 = vld [vmem:[%s219_s28] sm:$0xf]  ;;  %v262_v1 = vld [vmem:[%s228_s10] sm:$0xf] }
  0x7b   : > { %s421_s21 = sld [smem:[#allocation2 + $0x1]]  ;;  %s423_s5 = sshll.u32 %s688_s16, 1 }
  0x7c   : > { %s279_s20 = sadd.s32 %s684_s15, %s423_s5  ;;  %s256_s30 = scalar_lea.vmem [#allocation9], %s420_s22 }
  0x7d   : > { %s283_s9 = sshll.u32 %s256_s30, 4  ;;  %s424_s8 = sshll.u32 %s279_s20, 7  ;;  %s958_s9 = int_to_ptr.vmem [resolvable:$true] %s283_s9 }
  0x7e   : > { %s963_s16 = scalar_lea.hbm %s1018_s3, %s424_s8  ;;  %s268_s15 = scalar_lea.sflag [#allocation4], %s942_s1 }
  0x7f   : > { %s594_s4 = scalar_lea.vmem %s958_s9, 128  ;;  %p1051_p9 = scmp.ne.s32.totalorder %s1034_s24, 0 }
  0x80   : > { %v259_v2 = vstv %s258_s6  ;;  %p595_p13 = scmp.ne.s32.totalorder %s958_s9, %s594_s4  ;;  %s705_s7 = smov [#allocation9]  }
  0x81   : > { %v260_v3 = vmul.f32 %v259_v2, %v257_v0  ;;  %v264_v4 = vstv %s421_s21  ;;  %s598_s11 = sshll.u32 %s705_s7, 4  ;;  %s599_s11 = int_to_ptr.vmem [resolvable:$false] %s598_s11 }
  0x82   : > { %v265_v5 = vmul.f32 %v264_v4, %v262_v1  ;;  %p596_p1 = pnand %p595_p13, %p1051_p9  ;;  %s600_s0 = scalar_lea.vmem %s599_s11, 256 }
  0x83   : > { %261 = vst [vmem:[%s256_s30] sm:$0xf] %v260_v3  ;;  %p601_p3 = scmp.lt.s32.totalorder %s958_s9, %s599_s11  ;;  %p602_p4 = scmp.lt.s32.totalorder %s600_s0, %s594_s4 }
  0x84   : > { %266 = vst [vmem:[%s256_s30 + $0x4] sm:$0xf] %v265_v5  ;;  %p597_p11 = pneg %p596_p1 }
  0x85   : > { %p603_p5 = por %p602_p4, %p601_p3 }
  0x87   : > { %p604_p2 = pnand %p603_p5, %p597_p11 }
  0x89   : > { %607 = shalt.err (!%p604_p2)
}
  0x8a   : > { %s608_s1 = scalar_lea.hbm %s963_s16, 128  ;;  %s612_s26 = scalar_lea.hbm %s1018_s3, 512 }
  0x8b   : > { %p609_p6 = scmp.ne.s32.totalorder %s963_s16, %s608_s1  ;;  %p613_p7 = scmp.lt.u32.totalorder %s963_s16, %s1018_s3 }
  0x8c   : > { %p614_p12 = scmp.lt.u32.totalorder %s612_s26, %s608_s1  ;;  %p616_p13 = scmp.lt.u32.totalorder %s608_s1, %s963_s16 }
  0x8d   : > { %p610_p0 = pnand %p609_p6, %p1051_p9 }
  0x8e   : > { %p615_p10 = por %p614_p12, %p613_p7 }
  0x8f   : > { %p611_p8 = pneg %p610_p0 }
  0x90   : > { %p617_p1 = por %p616_p13, %p615_p10 }
  0x92   : > { %p618_p11 = pnand %p617_p1, %p611_p8 }
  0x94   : > { %621 = shalt.err (!%p618_p11)
}
  0x95   : > { %435 = dma.vmem_to_hbm [thread:$0]  (%p1051_p9), %s958_s9, 128, %s963_s16, %s268_s15  }
  0x96 PF: > { %s1052_s6 = sld [smem:[#allocation14_spill]]  ;;  %s1053_s21 = sld [smem:[#allocation15_spill]] }
  0x97   : > { %p455_p3 = scmp.ge.s32.totalorder %s700_s19, 2 }
  0x9c   : > { %s295_s5 = sand.u32 1, %s1052_s6   ;;  %p1054_p4 = scmp.ne.s32.totalorder %s1053_s21, 0 }
  0x9d   : > { %s296_s20 = scalar_lea.sflag [#allocation4], %s295_s5 }
  0x9e   : > { %p449_p5 = pnand %p455_p3, %p1054_p4 }
  0xa0   : > { %667 = dma.done.wait (!%p449_p5), %s296_s20, 128  }
  0xa1   : > { %669 = vsyncadd (!%p449_p5), %s296_s20, 4294967168  ;;  %s23_s19 = sadd.s32 1, %s700_s19   ;;  %s1055_s24 = smov %s870_s12 }
  0xa2   : > { %p20_p2 = scmp.ge.s32.totalorder %s23_s19, 6   ;;  %s1056_s30 = sld [smem:[#allocation16_spill]] }
  0xa3   : > { %s1057_s12 = smov %s676_s13  ;;  %s1058_s13 = smov %s680_s14 }
  0xa4   : > { %s1059_s14 = smov %s1055_s24  ;;  %s1060_s15 = smov %s692_s17 }
  0xa5   : > { %s1061_s16 = smov %s696_s18  ;;  %s1063_s18 = smov %s1069_s27 }
  0xa6   :  { %22 = sbr.rel (!%p20_p2) target bundleno = 13 (0xd), region = 95 }
  0xa8   : > { %s1062_s17 = smov %s1056_s30 }
  0xad   :  { %301 = vsyncpa [#allocation3], 1 }
  0xae   :  { %303 = vsyncpa [#allocation3 + $0x1], 1 }
  0xaf   :  { %304 = vsyncpa [#allocation8], 1 }
  0xb0   :  { %306 = vsyncpa [#allocation8 + $0x1], 1 }
  0xb1   :  { %307 = vsyncpa [#allocation4], 1 }
  0xb2   :  { %309 = vsyncpa [#allocation4 + $0x1], 1 }
  0xb3   :  { %310 = vsyncpa [#allocation5], 1 }
  0xb4   :  { %312 = vsyncpa [#allocation5 + $0x1], 1 }

</bundles_post_ra>
